<compile_context>
chip_gen: v6e
topology: v6e:2x2x1
jax: 0.10.0
libtpu: 0.0.40
codegen_flags: <defaults>
</compile_context>

<pallas_src>
import functools

import jax
import jax.numpy as jnp
from jax import lax
from jax.experimental import pallas as pl
from jax.experimental.pallas import tpu as pltpu

D = 2048
NB_PROTOTYPES = 6
LAMB = 0.5
TEMP = 10.0

# Per-tile reg partial tile: exactly one vreg; satisfies the (8,128) block rule.
_REG_TILE = (8, 128)


def _dist_tile(x_ref, pt_ref, yy_ref):
    """||x - p||^2 (expanded form) for the current (TB, D) x tile vs all prototypes."""
    xm = x_ref[...]                                          # (TB, D) native dtype
    x = xm.astype(jnp.float32)                               # elementwise math in f32
    # Plain (TB, D) @ (D, P): prototypes arrive pre-transposed from the wrapper,
    # so Mosaic never has to transpose the RHS inside the grid loop.
    xy = jnp.dot(xm, pt_ref[...], preferred_element_type=jnp.float32)   # (TB, P) MXU
    xx = jnp.sum(x * x, axis=1, keepdims=True)               # (TB, 1)
    # ||p||^2 computed once in the wrapper; rides in as a tiny resident block.
    return xx - 2.0 * xy + yy_ref[...]                       # (TB, P)


def _logits_kernel(x_ref, pt_ref, yy_ref, logits_ref, *, temp):
    logits_ref[...] = (-1.0 / temp) * _dist_tile(x_ref, pt_ref, yy_ref)


def _fused_kernel(x_ref, pt_ref, yy_ref, xl_ref, logits_ref, reg_ref, *,
                  temp, lamb, batch_total):
    i = pl.program_id(0)

    dist = _dist_tile(x_ref, pt_ref, yy_ref)                 # (TB, P)
    # Note: the expanded form can dip slightly negative from cancellation when
    # a sample coincides with a prototype; logits keep the raw value (matches
    # the PyTorch reference), the reg path clamps below.
    logits_ref[...] = (-1.0 / temp) * dist

    tb, num_p = dist.shape
    col = lax.broadcasted_iota(jnp.int32, (tb, num_p), 1)
    row = lax.broadcasted_iota(jnp.int32, (tb, num_p), 0)
    valid = (row + i * tb) < batch_total                     # mask ragged last tile
    onehot = (col == xl_ref[...]) & valid                    # xl_ref: (TB, 1) int32
    # jnp.where is a true select: garbage/NaN in padded rows never reaches reg.
    sel = jnp.where(onehot, jnp.maximum(dist, 0.0), 0.0)
    partial = (lamb / batch_total) * jnp.sum(sel)
    # Per-tile partial (no cross-iteration dependency -> "parallel" grid axis).
    reg_ref[...] = jnp.broadcast_to(partial, reg_ref.shape)


def _pick_batch_tile(B, block_b):
    if block_b is not None:
        tb = min(block_b, B)
    elif B <= 1024:
        tb = B
    else:
        # 16 MiB of double-buffered x + ~2 MiB lane-padded small blocks at
        # tb=1024 f32; fits the 32 MiB scoped limit requested below on every
        # generation (v5e needs the explicit limit, v7x stays under 64 MiB
        # physical with headroom).
        tb = 1024
    if tb < B and tb % 8:
        tb = max(8, (tb // 8) * 8)       # keep sublane alignment for partial tiles
    return tb


def predictor_forward(x, prototypes, xlabel=None, class_weights=None, *,
                      temp=TEMP, lamb=LAMB, block_b=None):
    """JAX/Pallas equivalent of Predictor.forward.

    x:          (B, 2048) float32 (or bfloat16: used as-is for the MXU matmul;
                no wrapper-side cast, so the bf16 HBM saving is only real if x
                already lives in HBM as bf16).
    prototypes: (P, 2048)
    xlabel:     optional (B,) int32 prototype index per sample
    """
    B, d = x.shape
    P = prototypes.shape[0]

    # Prototype-derived constants hoisted out of the grid (tiny one-off XLA ops
    # over P*D elements vs streaming B*D of x through the kernel).
    p_t = jnp.transpose(prototypes)                                       # (D, P)
    yy = jnp.sum(prototypes.astype(jnp.float32) ** 2, axis=1)[None, :]    # (1, P) f32

    tb = _pick_batch_tile(B, block_b)
    n_b = pl.cdiv(B, tb)

    x_spec = pl.BlockSpec((tb, d), lambda i: (i, 0))
    pt_spec = pl.BlockSpec((d, P), lambda i: (0, 0))        # resident
    yy_spec = pl.BlockSpec((1, P), lambda i: (0, 0))        # resident
    logits_spec = pl.BlockSpec((tb, P), lambda i: (i, 0))

    cparams = pltpu.CompilerParams(
        # No cross-step dependency on either path -> both TCs on v7x.
        dimension_semantics=("parallel",),
        # v5e scoped default is 16 MiB (too small for tb=1024); 32 MiB matches
        # the v6e/v7x default and is inside v7x's 64 MiB physical VMEM.
        vmem_limit_bytes=32 * 1024 * 1024,
    )

    if xlabel is not None:
        # TODO(synk): the class_weights branch in the PyTorch source references
        # an undefined `instance_weights` (source bug); unweighted path only.
        xl2d = xlabel.reshape(B, 1).astype(jnp.int32)
        xl_spec = pl.BlockSpec((tb, 1), lambda i: (i, 0))
        reg_spec = pl.BlockSpec((1,) + _REG_TILE, lambda i: (i, 0, 0))

        logits, partials = pl.pallas_call(
            functools.partial(_fused_kernel, temp=temp, lamb=lamb,
                              batch_total=B),
            out_shape=(jax.ShapeDtypeStruct((B, P), jnp.float32),
                       jax.ShapeDtypeStruct((n_b,) + _REG_TILE, jnp.float32)),
            grid=(n_b,),
            in_specs=[x_spec, pt_spec, yy_spec, xl_spec],
            out_specs=(logits_spec, reg_spec),
            compiler_params=cparams,
        )(x, p_t, yy, xl2d)
        reg = jnp.sum(partials[:, 0, 0])                     # n_b-element XLA reduce
        return logits, reg

    logits = pl.pallas_call(
        functools.partial(_logits_kernel, temp=temp),
        out_shape=jax.ShapeDtypeStruct((B, P), jnp.float32),
        grid=(n_b,),
        in_specs=[x_spec, pt_spec, yy_spec],
        out_specs=logits_spec,
        compiler_params=cparams,
    )(x, p_t, yy)
    return logits, jnp.array(0, dtype=jnp.int32)


def _reference(x, prototypes, xlabel=None, temp=TEMP, lamb=LAMB):
    xy = x @ prototypes.T
    xx = jnp.sum(x ** 2, axis=1, keepdims=True)
    yy = jnp.sum(prototypes.T ** 2, axis=0, keepdims=True)
    logits = (-1.0 / temp) * (xx - 2.0 * xy + yy)
    if xlabel is not None:
        pb = prototypes[xlabel]
        reg = lamb * jnp.sum((x - pb) ** 2) / x.shape[0]
        return logits, reg
    return logits, jnp.array(0, dtype=jnp.int32)


if __name__ == "__main__":
    key = jax.random.PRNGKey(0)
    k_x, k_p, k_l, k_x2, k_l2 = jax.random.split(key, 5)

    B = 8
    x = jax.random.normal(k_x, (B, D), dtype=jnp.float32)
    # torch.rand -> uniform [0, 1)
    prototypes = jax.random.uniform(k_p, (NB_PROTOTYPES, D), dtype=jnp.float32)
    xlabel = jax.random.randint(k_l, (B,), 0, NB_PROTOTYPES, dtype=jnp.int32)

    # Path 1: no labels -> (logits, 0)
    logits, zero = predictor_forward(x, prototypes)
    jax.block_until_ready(logits)

    # Path 2: labels -> (logits, compact_reg_loss), single fused kernel
    logits2, reg = predictor_forward(x, prototypes, xlabel=xlabel)
    jax.block_until_ready(reg)

    ref_logits, _ = _reference(x, prototypes)
    ref_logits2, ref_reg = _reference(x, prototypes, xlabel=xlabel)

    assert jnp.allclose(logits, ref_logits, rtol=1e-4, atol=1e-3), "logits mismatch"
    assert jnp.allclose(logits2, ref_logits2, rtol=1e-4, atol=1e-3), "logits mismatch"
    assert jnp.allclose(reg, ref_reg, rtol=1e-4, atol=1e-2), "reg loss mismatch"
    assert int(zero) == 0

    # Path 3: multi-tile labeled path with a ragged last tile (exercises the
    # per-tile reg partials + valid-row masking):  B=20, tb=8 -> grid (3,).
    B2 = 20
    x2 = jax.random.normal(k_x2, (B2, D), dtype=jnp.float32)
    xlabel2 = jax.random.randint(k_l2, (B2,), 0, NB_PROTOTYPES, dtype=jnp.int32)
    logits3, reg3 = predictor_forward(x2, prototypes, xlabel=xlabel2, block_b=8)
    jax.block_until_ready(reg3)
    ref_logits3, ref_reg3 = _reference(x2, prototypes, xlabel=xlabel2)
    assert jnp.allclose(logits3, ref_logits3, rtol=1e-4, atol=1e-3), "logits mismatch (tiled)"
    assert jnp.allclose(reg3, ref_reg3, rtol=1e-4, atol=1e-2), "reg loss mismatch (tiled)"

    print("KERNEL_OK")
</pallas_src>

<mosaic_0001>
module attributes {stable_mosaic.version = 11 : i64} {
  func.func @_logits_kernel(%arg0: i32, %arg1: memref<8x2048xf32, #tpu.memory_space<vmem>>, %arg2: memref<2048x6xf32, #tpu.memory_space<vmem>>, %arg3: memref<1x6xf32, #tpu.memory_space<vmem>>, %arg4: memref<8x6xf32, #tpu.memory_space<vmem>>) attributes {dimension_semantics = [#tpu.dimension_semantics<parallel>], iteration_bounds = array<i64: 1>, scalar_prefetch = 0 : i64, scratch_operands = 0 : i64, tpu.core_type = #tpu.core_type<tc>, window_params = [{transform_indices = @transform_0, window_bounds = array<i64: 8, 2048>}, {pipeline_mode = #tpu.pipeline_mode<synchronous>, transform_indices = @transform_1, window_bounds = array<i64: 2048, 6>}, {pipeline_mode = #tpu.pipeline_mode<synchronous>, transform_indices = @transform_2, window_bounds = array<i64: 1, 6>}, {transform_indices = @transform_3, window_bounds = array<i64: 8, 6>}]} {
    %c0 = arith.constant 0 : index
    %c0_0 = arith.constant 0 : index
    %0 = vector.load %arg1[%c0, %c0_0] : memref<8x2048xf32, #tpu.memory_space<vmem>>, vector<8x2048xf32>
    %c0_1 = arith.constant 0 : index
    %c0_2 = arith.constant 0 : index
    %1 = vector.load %arg2[%c0_1, %c0_2] : memref<2048x6xf32, #tpu.memory_space<vmem>>, vector<2048x6xf32>
    %cst = arith.constant dense<0.000000e+00> : vector<8x6xf32>
    %2 = tpu.matmul %0, %1, %cst {dimension_numbers = #tpu.dot_dimension_numbers<[1], [0], [0], [1], [0, 0, 1, 1], [], []>} : vector<8x2048xf32>, vector<2048x6xf32>, vector<8x6xf32> -> vector<8x6xf32>
    %3 = arith.mulf %0, %0 : vector<8x2048xf32>
    %cst_3 = arith.constant dense<0.000000e+00> : vector<8xf32>
    %4 = vector.multi_reduction <add>, %3, %cst_3 [1] : vector<8x2048xf32> to vector<8xf32>
    %5 = vector.shape_cast %4 : vector<8xf32> to vector<8x1xf32>
    %cst_4 = arith.constant 2.000000e+00 : f32
    %6 = vector.broadcast %cst_4 : f32 to vector<8x6xf32>
    %7 = arith.mulf %6, %2 : vector<8x6xf32>
    %8 = vector.broadcast %5 : vector<8x1xf32> to vector<8x6xf32>
    %9 = arith.subf %8, %7 : vector<8x6xf32>
    %c0_5 = arith.constant 0 : index
    %c0_6 = arith.constant 0 : index
    %10 = vector.load %arg3[%c0_5, %c0_6] : memref<1x6xf32, #tpu.memory_space<vmem>>, vector<1x6xf32>
    %11 = vector.broadcast %10 : vector<1x6xf32> to vector<8x6xf32>
    %12 = arith.addf %9, %11 : vector<8x6xf32>
    %cst_7 = arith.constant -1.000000e-01 : f32
    %13 = vector.broadcast %cst_7 : f32 to vector<8x6xf32>
    %14 = arith.mulf %13, %12 : vector<8x6xf32>
    %c0_8 = arith.constant 0 : index
    %c0_9 = arith.constant 0 : index
    %15 = vector.load %arg4[%c0_8, %c0_9] : memref<8x6xf32, #tpu.memory_space<vmem>>, vector<8x6xf32>
    tpu.vector_store %arg4[%c0_8, %c0_9], %14 {strides = array<i32>} : memref<8x6xf32, #tpu.memory_space<vmem>>, vector<8x6xf32>,
    return
  }
  func.func @transform_0(%arg0: i32) -> (i32, i32) {
    %c0_i32 = arith.constant 0 : i32
    %c0_i32_0 = arith.constant 0 : i32
    return %arg0, %c0_i32 : i32, i32
  }
  func.func @transform_1(%arg0: i32) -> (i32, i32) {
    %c0_i32 = arith.constant 0 : i32
    %c0_i32_0 = arith.constant 0 : i32
    %c0_i32_1 = arith.constant 0 : i32
    return %c0_i32, %c0_i32_0 : i32, i32
  }
  func.func @transform_2(%arg0: i32) -> (i32, i32) {
    %c0_i32 = arith.constant 0 : i32
    %c0_i32_0 = arith.constant 0 : i32
    %c0_i32_1 = arith.constant 0 : i32
    return %c0_i32, %c0_i32_0 : i32, i32
  }
  func.func @transform_3(%arg0: i32) -> (i32, i32) {
    %c0_i32 = arith.constant 0 : i32
    %c0_i32_0 = arith.constant 0 : i32
    return %arg0, %c0_i32 : i32, i32
  }
}

</mosaic_0001>

<bundles_post_ra>
// kernel: tpu_custom_call.1
= control target key start
LH: loop header
LB: loop body
LE: loop exit
PB: predicated region body
PF: predicated region fallthrough
CT: control target
= control target key end

     0   :  { %s2082_s0 = inlined_call_operand.vmem [shape: f32[8,2048], index: 0, kind: input, shape index: {}]   ;;  %s2083_s1 = inlined_call_operand.vmem [shape: f32[2048,6], index: 1, kind: input, shape index: {}]   ;;  %s2084_s2 = inlined_call_operand.vmem [shape: f32[1,6], index: 2, kind: input, shape index: {}]   ;;  %s2085_s3 = inlined_call_operand.hbm [shape: f32[8,6], index: 3, kind: output, shape index: {}]  }
   0x1   :  { %v62_v0 = vld [vmem:[%s2083_s1 + $0xf8] sm:$0xff]  ;;  %v61_v4 = vld [vmem:[%s2083_s1 + $0xf0] sm:$0xff]  ;;  %v60_v8 = vld [vmem:[%s2083_s1 + $0xe8] sm:$0xff] }
   0x2   :  { %v94_v1 = vld [vmem:[%s2083_s1 + $0x1f8] sm:$0xff]  ;;  %908 = vmatprep.subr.mxu0 %v62_v0  ;;  %v93_v5 = vld [vmem:[%s2083_s1 + $0x1f0] sm:$0xff]  ;;  %v92_v9 = vld [vmem:[%s2083_s1 + $0x1e8] sm:$0xff] }
   0x3   :  { %v46_v2 = vld [vmem:[%s2083_s1 + $0x78] sm:$0xff]  ;;  %943 = vmatprep.subr.mxu1 %v94_v1  ;;  %v45_v6 = vld [vmem:[%s2083_s1 + $0x70] sm:$0xff]  ;;  %v44_v10 = vld [vmem:[%s2083_s1 + $0x68] sm:$0xff] }
   0x4   :  { %v78_v3 = vld [vmem:[%s2083_s1 + $0x178] sm:$0xff]  ;;  %909 = vmatpush3.msra.mxu0 %v46_v2  ;;  %v77_v7 = vld [vmem:[%s2083_s1 + $0x170] sm:$0xff]  ;;  %v76_v11 = vld [vmem:[%s2083_s1 + $0x168] sm:$0xff] }
   0x5   :  { %944 = vmatpush3.msra.mxu1 %v78_v3  ;;  %910 = vmatprep.subr.mxu0 %v61_v4  ;;  %v59_v12 = vld [vmem:[%s2083_s1 + $0xe0] sm:$0xff]  ;;  %v58_v16 = vld [vmem:[%s2083_s1 + $0xd8] sm:$0xff]  ;;  %v57_v20 = vld [vmem:[%s2083_s1 + $0xd0] sm:$0xff] }
   0x6   :  { %945 = vmatprep.subr.mxu1 %v93_v5  ;;  %911 = vmatpush3.msra.mxu0 %v45_v6  ;;  %v91_v13 = vld [vmem:[%s2083_s1 + $0x1e0] sm:$0xff]  ;;  %v90_v17 = vld [vmem:[%s2083_s1 + $0x1d8] sm:$0xff]  ;;  %v89_v21 = vld [vmem:[%s2083_s1 + $0x1d0] sm:$0xff] }
   0x7   :  { %946 = vmatpush3.msra.mxu1 %v77_v7  ;;  %912 = vmatprep.subr.mxu0 %v60_v8  ;;  %v43_v14 = vld [vmem:[%s2083_s1 + $0x60] sm:$0xff]  ;;  %v42_v18 = vld [vmem:[%s2083_s1 + $0x58] sm:$0xff]  ;;  %v41_v22 = vld [vmem:[%s2083_s1 + $0x50] sm:$0xff] }
   0x8   :  { %947 = vmatprep.subr.mxu1 %v92_v9  ;;  %v75_v15 = vld [vmem:[%s2083_s1 + $0x160] sm:$0xff]  ;;  %913 = vmatpush3.msra.mxu0 %v44_v10  ;;  %v74_v19 = vld [vmem:[%s2083_s1 + $0x158] sm:$0xff]  ;;  %v73_v23 = vld [vmem:[%s2083_s1 + $0x150] sm:$0xff] }
   0x9   :  { %948 = vmatpush3.msra.mxu1 %v76_v11  ;;  %914 = vmatprep.subr.mxu0 %v59_v12  ;;  %v56_v24 = vld [vmem:[%s2083_s1 + $0xc8] sm:$0xff]  ;;  %v55_v28 = vld [vmem:[%s2083_s1 + $0xc0] sm:$0xff]  ;;  %v54_v32 = vld [vmem:[%s2083_s1 + $0xb8] sm:$0xff] }
   0xa   :  { %949 = vmatprep.subr.mxu1 %v91_v13  ;;  %915 = vmatpush3.msra.mxu0 %v43_v14  ;;  %v88_v25 = vld [vmem:[%s2083_s1 + $0x1c8] sm:$0xff]  ;;  %v87_v29 = vld [vmem:[%s2083_s1 + $0x1c0] sm:$0xff]  ;;  %v86_v33 = vld [vmem:[%s2083_s1 + $0x1b8] sm:$0xff] }
   0xb   :  { %950 = vmatpush3.msra.mxu1 %v75_v15  ;;  %916 = vmatprep.subr.mxu0 %v58_v16  ;;  %v40_v26 = vld [vmem:[%s2083_s1 + $0x48] sm:$0xff]  ;;  %v39_v30 = vld [vmem:[%s2083_s1 + $0x40] sm:$0xff]  ;;  %v38_v34 = vld [vmem:[%s2083_s1 + $0x38] sm:$0xff] }
   0xc   :  { %951 = vmatprep.subr.mxu1 %v90_v17  ;;  %917 = vmatpush3.msra.mxu0 %v42_v18  ;;  %v72_v27 = vld [vmem:[%s2083_s1 + $0x148] sm:$0xff]  ;;  %v71_v31 = vld [vmem:[%s2083_s1 + $0x140] sm:$0xff]  ;;  %v70_v35 = vld [vmem:[%s2083_s1 + $0x138] sm:$0xff] }
   0xd   :  { %952 = vmatpush3.msra.mxu1 %v74_v19  ;;  %918 = vmatprep.subr.mxu0 %v57_v20  ;;  %v53_v36 = vld [vmem:[%s2083_s1 + $0xb0] sm:$0xff]  ;;  %v52_v40 = vld [vmem:[%s2083_s1 + $0xa8] sm:$0xff]  ;;  %v51_v44 = vld [vmem:[%s2083_s1 + $0xa0] sm:$0xff] }
   0xe   :  { %953 = vmatprep.subr.mxu1 %v89_v21  ;;  %919 = vmatpush3.msra.mxu0 %v41_v22  ;;  %v85_v37 = vld [vmem:[%s2083_s1 + $0x1b0] sm:$0xff]  ;;  %v84_v41 = vld [vmem:[%s2083_s1 + $0x1a8] sm:$0xff]  ;;  %v83_v45 = vld [vmem:[%s2083_s1 + $0x1a0] sm:$0xff] }
   0xf   :  { %954 = vmatpush3.msra.mxu1 %v73_v23  ;;  %920 = vmatprep.subr.mxu0 %v56_v24  ;;  %v37_v38 = vld [vmem:[%s2083_s1 + $0x30] sm:$0xff]  ;;  %v36_v42 = vld [vmem:[%s2083_s1 + $0x28] sm:$0xff]  ;;  %v35_v46 = vld [vmem:[%s2083_s1 + $0x20] sm:$0xff] }
  0x10   :  { %955 = vmatprep.subr.mxu1 %v88_v25  ;;  %921 = vmatpush3.msra.mxu0 %v40_v26  ;;  %v69_v39 = vld [vmem:[%s2083_s1 + $0x130] sm:$0xff]  ;;  %v68_v43 = vld [vmem:[%s2083_s1 + $0x128] sm:$0xff]  ;;  %v67_v47 = vld [vmem:[%s2083_s1 + $0x120] sm:$0xff] }
  0x11   :  { %956 = vmatpush3.msra.mxu1 %v72_v27  ;;  %922 = vmatprep.subr.mxu0 %v55_v28  ;;  %v50_v48 = vld [vmem:[%s2083_s1 + $0x98] sm:$0xff]  ;;  %v16_v49 = vld [vmem:[%s2082_s0 + $0x8] sm:$0xff]  ;;  %v15_v52 = vld [vmem:[%s2082_s0] sm:$0xff] }
  0x12   :  { %957 = vmatprep.subr.mxu1 %v87_v29  ;;  %923 = vmatpush3.msra.mxu0 %v39_v30  ;;  %v82_v50 = vld [vmem:[%s2083_s1 + $0x198] sm:$0xff]  ;;  %v848_v51 = vmul.f32 %v16_v49, %v16_v49  ;;  %v17_v53 = vld [vmem:[%s2082_s0 + $0x10] sm:$0xff]  ;;  %v847_v56 = vmul.f32 %v15_v52, %v15_v52  ;;  %v48_v1 = vld [vmem:[%s2083_s1 + $0x88] sm:$0xff] }
  0x13   :  { %958 = vmatpush3.msra.mxu1 %v71_v31  ;;  %924 = vmatprep.subr.mxu0 %v54_v32  ;;  %v34_v54 = vld [vmem:[%s2083_s1 + $0x18] sm:$0xff]  ;;  %v849_v57 = vmul.f32 %v17_v53, %v17_v53  ;;  %v49_v58 = vld [vmem:[%s2083_s1 + $0x90] sm:$0xff]  ;;  %v80_v2 = vld [vmem:[%s2083_s1 + $0x188] sm:$0xff] }
  0x14   :  { %959 = vmatprep.subr.mxu1 %v86_v33  ;;  %925 = vmatpush3.msra.mxu0 %v38_v34  ;;  %v66_v55 = vld [vmem:[%s2083_s1 + $0x118] sm:$0xff]  ;;  %v81_v59 = vld [vmem:[%s2083_s1 + $0x190] sm:$0xff]  ;;  %v863_v0 = vadd.f32 %v848_v51, %v847_v56  ;;  %v32_v3 = vld [vmem:[%s2083_s1 + $0x8] sm:$0xff] }
  0x15   :  { %960 = vmatpush3.msra.mxu1 %v70_v35  ;;  %926 = vmatprep.subr.mxu0 %v53_v36  ;;  %v18_v60 = vld [vmem:[%s2082_s0 + $0x18] sm:$0xff]  ;;  %v33_v61 = vld [vmem:[%s2083_s1 + $0x10] sm:$0xff]  ;;  %v64_v4 = vld [vmem:[%s2083_s1 + $0x108] sm:$0xff] }
  0x16   :  { %961 = vmatprep.subr.mxu1 %v85_v37  ;;  %927 = vmatpush3.msra.mxu0 %v37_v38  ;;  %v65_v62 = vld [vmem:[%s2083_s1 + $0x110] sm:$0xff]  ;;  %v850_v63 = vmul.f32 %v18_v60, %v18_v60  ;;  %v864_v5 = vadd.f32 %v863_v0, %v849_v57  ;;  %v47_v6 = vld [vmem:[%s2083_s1 + $0x80] sm:$0xff]  ;;  %v126_v11 = vld [vmem:[%s2083_s1 + $0x2f8] sm:$0xff] }
  0x17   :  { %962 = vmatpush3.msra.mxu1 %v69_v39  ;;  %928 = vmatprep.subr.mxu0 %v52_v40  ;;  %v79_v7 = vld [vmem:[%s2083_s1 + $0x180] sm:$0xff]  ;;  %v158_v12 = vld [vmem:[%s2083_s1 + $0x3f8] sm:$0xff]  ;;  %v125_v15 = vld [vmem:[%s2083_s1 + $0x2f0] sm:$0xff] }
  0x18   :  { %963 = vmatprep.subr.mxu1 %v84_v41  ;;  %929 = vmatpush3.msra.mxu0 %v36_v42  ;;  %v31_v8 = vld [vmem:[%s2083_s1] sm:$0xff]  ;;  %v1433_v9 = vadd.f32 %v864_v5, %v850_v63  ;;  %v110_v13 = vld [vmem:[%s2083_s1 + $0x278] sm:$0xff]  ;;  %v157_v16 = vld [vmem:[%s2083_s1 + $0x3f0] sm:$0xff] }
  0x19   :  { %964 = vmatpush3.msra.mxu1 %v68_v43  ;;  %930 = vmatprep.subr.mxu0 %v51_v44  ;;  %v63_v10 = vld [vmem:[%s2083_s1 + $0x100] sm:$0xff]  ;;  %v142_v14 = vld [vmem:[%s2083_s1 + $0x378] sm:$0xff]  ;;  %v109_v17 = vld [vmem:[%s2083_s1 + $0x270] sm:$0xff] }
  0x1a   :  { %965 = vmatprep.subr.mxu1 %v83_v45  ;;  %931 = vmatpush3.msra.mxu0 %v35_v46  ;;  %v141_v18 = vld [vmem:[%s2083_s1 + $0x370] sm:$0xff]  ;;  %v124_v19 = vld [vmem:[%s2083_s1 + $0x2e8] sm:$0xff]  ;;  %v123_v23 = vld [vmem:[%s2083_s1 + $0x2e0] sm:$0xff] }
  0x1b   :  { %966 = vmatpush3.msra.mxu1 %v67_v47  ;;  %932 = vmatprep.subr.mxu0 %v50_v48  ;;  %v156_v20 = vld [vmem:[%s2083_s1 + $0x3e8] sm:$0xff]  ;;  %v155_v24 = vld [vmem:[%s2083_s1 + $0x3e0] sm:$0xff]  ;;  %v122_v27 = vld [vmem:[%s2083_s1 + $0x2d8] sm:$0xff] }
  0x1c   :  { %967 = vmatprep.subr.mxu1 %v82_v50  ;;  %933 = vmatpush3.msra.mxu0 %v34_v54  ;;  %v108_v21 = vld [vmem:[%s2083_s1 + $0x268] sm:$0xff]  ;;  %v107_v25 = vld [vmem:[%s2083_s1 + $0x260] sm:$0xff]  ;;  %v154_v28 = vld [vmem:[%s2083_s1 + $0x3d8] sm:$0xff] }
  0x1d   :  { %968 = vmatpush3.msra.mxu1 %v66_v55  ;;  %934 = vmatprep.subr.mxu0 %v49_v58  ;;  %v140_v22 = vld [vmem:[%s2083_s1 + $0x368] sm:$0xff]  ;;  %v139_v26 = vld [vmem:[%s2083_s1 + $0x360] sm:$0xff]  ;;  %v106_v29 = vld [vmem:[%s2083_s1 + $0x258] sm:$0xff] }
  0x1e   :  { %969 = vmatprep.subr.mxu1 %v81_v59  ;;  %935 = vmatpush3.msra.mxu0 %v33_v61  ;;  %v138_v30 = vld [vmem:[%s2083_s1 + $0x358] sm:$0xff]  ;;  %v121_v31 = vld [vmem:[%s2083_s1 + $0x2d0] sm:$0xff]  ;;  %v120_v35 = vld [vmem:[%s2083_s1 + $0x2c8] sm:$0xff] }
  0x1f   :  { %970 = vmatpush3.msra.mxu1 %v65_v62  ;;  %936 = vmatprep.subr.mxu0 %v48_v1  ;;  %v153_v32 = vld [vmem:[%s2083_s1 + $0x3d0] sm:$0xff]  ;;  %v152_v36 = vld [vmem:[%s2083_s1 + $0x3c8] sm:$0xff]  ;;  %v119_v39 = vld [vmem:[%s2083_s1 + $0x2c0] sm:$0xff] }
  0x20   :  { %971 = vmatprep.subr.mxu1 %v80_v2  ;;  %937 = vmatpush3.msra.mxu0 %v32_v3  ;;  %v105_v33 = vld [vmem:[%s2083_s1 + $0x250] sm:$0xff]  ;;  %v104_v37 = vld [vmem:[%s2083_s1 + $0x248] sm:$0xff]  ;;  %v151_v40 = vld [vmem:[%s2083_s1 + $0x3c0] sm:$0xff] }
  0x21   :  { %972 = vmatpush3.msra.mxu1 %v64_v4  ;;  %938 = vmatprep.subr.mxu0 %v47_v6  ;;  %v137_v34 = vld [vmem:[%s2083_s1 + $0x350] sm:$0xff]  ;;  %v136_v38 = vld [vmem:[%s2083_s1 + $0x348] sm:$0xff]  ;;  %v103_v41 = vld [vmem:[%s2083_s1 + $0x240] sm:$0xff] }
  0x22   :  { %973 = vmatprep.subr.mxu1 %v79_v7  ;;  %939 = vmatpush3.msra.mxu0 %v31_v8  ;;  %v135_v42 = vld [vmem:[%s2083_s1 + $0x340] sm:$0xff]  ;;  %v118_v43 = vld [vmem:[%s2083_s1 + $0x2b8] sm:$0xff]  ;;  %v117_v47 = vld [vmem:[%s2083_s1 + $0x2b0] sm:$0xff] }
  0x23   :  { %351 = vmatprep.mubr.f32.mxu0 %v16_v49  ;;  %974 = vmatpush3.msra.mxu1 %v63_v10  ;;  %v150_v44 = vld [vmem:[%s2083_s1 + $0x3b8] sm:$0xff]  ;;  %v149_v48 = vld [vmem:[%s2083_s1 + $0x3b0] sm:$0xff]  ;;  %v116_v51 = vld [vmem:[%s2083_s1 + $0x2a8] sm:$0xff] }
  0x24   :  { %421 = vmatprep.mubr.f32.mxu1 %v18_v60  ;;  %352 = vmatmul.mubr.f32.vlgmr.msra.gmra.mxu0 %v15_v52  ;;  %v102_v45 = vld [vmem:[%s2083_s1 + $0x238] sm:$0xff]  ;;  %v101_v49 = vld [vmem:[%s2083_s1 + $0x230] sm:$0xff]  ;;  %v148_v52 = vld [vmem:[%s2083_s1 + $0x3a8] sm:$0xff] }
  0x25   :  { %422 = vmatmul.mubr.f32.vlgmr.msra.gmra.mxu1 %v17_v53  ;;  %978 = vmatprep.subr.mxu0 %v126_v11  ;;  %v134_v46 = vld [vmem:[%s2083_s1 + $0x338] sm:$0xff]  ;;  %v133_v50 = vld [vmem:[%s2083_s1 + $0x330] sm:$0xff]  ;;  %v100_v53 = vld [vmem:[%s2083_s1 + $0x228] sm:$0xff] }
  0x26   :  { %1013 = vmatprep.subr.mxu1 %v158_v12  ;;  %979 = vmatpush3.msra.mxu0 %v110_v13  ;;  %v132_v54 = vld [vmem:[%s2083_s1 + $0x328] sm:$0xff]  ;;  %v115_v55 = vld [vmem:[%s2083_s1 + $0x2a0] sm:$0xff]  ;;  %v114_v59 = vld [vmem:[%s2083_s1 + $0x298] sm:$0xff] }
  0x27   :  { %1014 = vmatpush3.msra.mxu1 %v142_v14  ;;  %980 = vmatprep.subr.mxu0 %v125_v15  ;;  %v147_v56 = vld [vmem:[%s2083_s1 + $0x3a0] sm:$0xff]  ;;  %v146_v60 = vld [vmem:[%s2083_s1 + $0x398] sm:$0xff]  ;;  %v113_v63 = vld [vmem:[%s2083_s1 + $0x290] sm:$0xff] }
  0x28   :  { %1015 = vmatprep.subr.mxu1 %v157_v16  ;;  %981 = vmatpush3.msra.mxu0 %v109_v17  ;;  %v99_v57 = vld [vmem:[%s2083_s1 + $0x220] sm:$0xff]  ;;  %v98_v61 = vld [vmem:[%s2083_s1 + $0x218] sm:$0xff]  ;;  %v145_v0 = vld [vmem:[%s2083_s1 + $0x390] sm:$0xff] }
  0x29   :  { %1016 = vmatpush3.msra.mxu1 %v141_v18  ;;  %982 = vmatprep.subr.mxu0 %v124_v19  ;;  %v131_v58 = vld [vmem:[%s2083_s1 + $0x320] sm:$0xff]  ;;  %v130_v62 = vld [vmem:[%s2083_s1 + $0x318] sm:$0xff]  ;;  %v97_v1 = vld [vmem:[%s2083_s1 + $0x210] sm:$0xff] }
  0x2a   :  { %1017 = vmatprep.subr.mxu1 %v156_v20  ;;  %983 = vmatpush3.msra.mxu0 %v108_v21  ;;  %v129_v2 = vld [vmem:[%s2083_s1 + $0x310] sm:$0xff]  ;;  %v112_v3 = vld [vmem:[%s2083_s1 + $0x288] sm:$0xff]  ;;  %v111_v7 = vld [vmem:[%s2083_s1 + $0x280] sm:$0xff] }
  0x2b   :  { %1018 = vmatpush3.msra.mxu1 %v140_v22  ;;  %984 = vmatprep.subr.mxu0 %v123_v23  ;;  %v144_v4 = vld [vmem:[%s2083_s1 + $0x388] sm:$0xff]  ;;  %v143_v8 = vld [vmem:[%s2083_s1 + $0x380] sm:$0xff]  ;;  %v1643_v14 = vld [vmem:[%s2082_s0 + $0x38] sm:$0xff] }
  0x2c   :  { %1019 = vmatprep.subr.mxu1 %v155_v24  ;;  %985 = vmatpush3.msra.mxu0 %v107_v25  ;;  %v96_v5 = vld [vmem:[%s2083_s1 + $0x208] sm:$0xff]  ;;  %v95_v10 = vld [vmem:[%s2083_s1 + $0x200] sm:$0xff]  ;;  %v190_v15 = vld [vmem:[%s2083_s1 + $0x4f8] sm:$0xff] }
  0x2d   :  { %1020 = vmatpush3.msra.mxu1 %v139_v26  ;;  %986 = vmatprep.subr.mxu0 %v122_v27  ;;  %v128_v6 = vld [vmem:[%s2083_s1 + $0x308] sm:$0xff]  ;;  %v127_v12 = vld [vmem:[%s2083_s1 + $0x300] sm:$0xff]  ;;  %v222_v16 = vld [vmem:[%s2083_s1 + $0x5f8] sm:$0xff] }
  0x2e   :  { %1021 = vmatprep.subr.mxu1 %v154_v28  ;;  %987 = vmatpush3.msra.mxu0 %v106_v29  ;;  %v1630_v11 = vld [vmem:[%s2082_s0 + $0x28] sm:$0xff]  ;;  %v1638_v13 = vld [vmem:[%s2082_s0 + $0x20] sm:$0xff]  ;;  %v1655_v17 = vld [vmem:[%s2082_s0 + $0x30] sm:$0xff] }
  0x2f   :  { %1022 = vmatpush3.msra.mxu1 %v138_v30  ;;  %988 = vmatprep.subr.mxu0 %v121_v31  ;;  %v174_v18 = vld [vmem:[%s2083_s1 + $0x478] sm:$0xff]  ;;  %v189_v20 = vld [vmem:[%s2083_s1 + $0x4f0] sm:$0xff]  ;;  %v188_v24 = vld [vmem:[%s2083_s1 + $0x4e8] sm:$0xff] }
  0x30   :  { %1023 = vmatprep.subr.mxu1 %v153_v32  ;;  %989 = vmatpush3.msra.mxu0 %v105_v33  ;;  %v206_v19 = vld [vmem:[%s2083_s1 + $0x578] sm:$0xff]  ;;  %v221_v21 = vld [vmem:[%s2083_s1 + $0x5f0] sm:$0xff]  ;;  %v220_v25 = vld [vmem:[%s2083_s1 + $0x5e8] sm:$0xff] }
  0x31   :  { %1024 = vmatpush3.msra.mxu1 %v137_v34  ;;  %990 = vmatprep.subr.mxu0 %v120_v35  ;;  %v173_v22 = vld [vmem:[%s2083_s1 + $0x470] sm:$0xff]  ;;  %v172_v26 = vld [vmem:[%s2083_s1 + $0x468] sm:$0xff]  ;;  %v187_v28 = vld [vmem:[%s2083_s1 + $0x4e0] sm:$0xff] }
  0x32   :  { %1025 = vmatprep.subr.mxu1 %v152_v36  ;;  %991 = vmatpush3.msra.mxu0 %v104_v37  ;;  %v205_v23 = vld [vmem:[%s2083_s1 + $0x570] sm:$0xff]  ;;  %v204_v27 = vld [vmem:[%s2083_s1 + $0x568] sm:$0xff]  ;;  %v219_v29 = vld [vmem:[%s2083_s1 + $0x5e0] sm:$0xff] }
  0x33   :  { %1026 = vmatpush3.msra.mxu1 %v136_v38  ;;  %992 = vmatprep.subr.mxu0 %v119_v39  ;;  %v171_v30 = vld [vmem:[%s2083_s1 + $0x460] sm:$0xff]  ;;  %v186_v32 = vld [vmem:[%s2083_s1 + $0x4d8] sm:$0xff]  ;;  %v185_v36 = vld [vmem:[%s2083_s1 + $0x4d0] sm:$0xff] }
  0x34   :  { %1027 = vmatprep.subr.mxu1 %v151_v40  ;;  %993 = vmatpush3.msra.mxu0 %v103_v41  ;;  %v203_v31 = vld [vmem:[%s2083_s1 + $0x560] sm:$0xff]  ;;  %v218_v33 = vld [vmem:[%s2083_s1 + $0x5d8] sm:$0xff]  ;;  %v217_v37 = vld [vmem:[%s2083_s1 + $0x5d0] sm:$0xff] }
  0x35   :  { %1028 = vmatpush3.msra.mxu1 %v135_v42  ;;  %994 = vmatprep.subr.mxu0 %v118_v43  ;;  %v170_v34 = vld [vmem:[%s2083_s1 + $0x458] sm:$0xff]  ;;  %v169_v38 = vld [vmem:[%s2083_s1 + $0x450] sm:$0xff]  ;;  %v184_v40 = vld [vmem:[%s2083_s1 + $0x4c8] sm:$0xff] }
  0x36   :  { %1029 = vmatprep.subr.mxu1 %v150_v44  ;;  %995 = vmatpush3.msra.mxu0 %v102_v45  ;;  %v202_v35 = vld [vmem:[%s2083_s1 + $0x558] sm:$0xff]  ;;  %v201_v39 = vld [vmem:[%s2083_s1 + $0x550] sm:$0xff]  ;;  %v216_v41 = vld [vmem:[%s2083_s1 + $0x5c8] sm:$0xff] }
  0x37   :  { %1030 = vmatpush3.msra.mxu1 %v134_v46  ;;  %996 = vmatprep.subr.mxu0 %v117_v47  ;;  %v168_v42 = vld [vmem:[%s2083_s1 + $0x448] sm:$0xff]  ;;  %v183_v44 = vld [vmem:[%s2083_s1 + $0x4c0] sm:$0xff] }
  0x38   :  { %1031 = vmatprep.subr.mxu1 %v149_v48  ;;  %997 = vmatpush3.msra.mxu0 %v101_v49  ;;  %v200_v43 = vld [vmem:[%s2083_s1 + $0x548] sm:$0xff]  ;;  %v215_v45 = vld [vmem:[%s2083_s1 + $0x5c0] sm:$0xff]  ;;  %v182_v48 = vld [vmem:[%s2083_s1 + $0x4b8] sm:$0xff] }
  0x39   :  { %1032 = vmatpush3.msra.mxu1 %v133_v50  ;;  %998 = vmatprep.subr.mxu0 %v116_v51  ;;  %v167_v46 = vld [vmem:[%s2083_s1 + $0x440] sm:$0xff]  ;;  %v214_v49 = vld [vmem:[%s2083_s1 + $0x5b8] sm:$0xff] }
  0x3a   :  { %1033 = vmatprep.subr.mxu1 %v148_v52  ;;  %999 = vmatpush3.msra.mxu0 %v100_v53  ;;  %v199_v47 = vld [vmem:[%s2083_s1 + $0x540] sm:$0xff]  ;;  %v166_v50 = vld [vmem:[%s2083_s1 + $0x438] sm:$0xff]  ;;  %v181_v52 = vld [vmem:[%s2083_s1 + $0x4b0] sm:$0xff] }
  0x3b   :  { %1034 = vmatpush3.msra.mxu1 %v132_v54  ;;  %1000 = vmatprep.subr.mxu0 %v115_v55  ;;  %v198_v51 = vld [vmem:[%s2083_s1 + $0x538] sm:$0xff]  ;;  %v213_v53 = vld [vmem:[%s2083_s1 + $0x5b0] sm:$0xff]  ;;  %v851_v54 = vmul.f32 %v1638_v13, %v1638_v13 }
  0x3c   :  { %1035 = vmatprep.subr.mxu1 %v147_v56  ;;  %1001 = vmatpush3.msra.mxu0 %v99_v57  ;;  %v165_v55 = vld [vmem:[%s2083_s1 + $0x430] sm:$0xff]  ;;  %v180_v57 = vld [vmem:[%s2083_s1 + $0x4a8] sm:$0xff] }
  0x3d   :  { %1036 = vmatpush3.msra.mxu1 %v131_v58  ;;  %1002 = vmatprep.subr.mxu0 %v114_v59  ;;  %v197_v56 = vld [vmem:[%s2083_s1 + $0x530] sm:$0xff]  ;;  %v212_v58 = vld [vmem:[%s2083_s1 + $0x5a8] sm:$0xff] }
  0x3e   :  { %1037 = vmatprep.subr.mxu1 %v146_v60  ;;  %1003 = vmatpush3.msra.mxu0 %v98_v61  ;;  %v164_v59 = vld [vmem:[%s2083_s1 + $0x428] sm:$0xff]  ;;  %v179_v61 = vld [vmem:[%s2083_s1 + $0x4a0] sm:$0xff] }
  0x3f   :  { %1038 = vmatpush3.msra.mxu1 %v130_v62  ;;  %1004 = vmatprep.subr.mxu0 %v113_v63  ;;  %v196_v60 = vld [vmem:[%s2083_s1 + $0x528] sm:$0xff]  ;;  %v211_v62 = vld [vmem:[%s2083_s1 + $0x5a0] sm:$0xff]  ;;  %v852_v63 = vmul.f32 %v1630_v11, %v1630_v11 }
  0x40   :  { %1039 = vmatprep.subr.mxu1 %v145_v0  ;;  %1005 = vmatpush3.msra.mxu0 %v97_v1  ;;  %v866_v0 = vadd.f32 %v1433_v9, %v851_v54  ;;  %v163_v1 = vld [vmem:[%s2083_s1 + $0x420] sm:$0xff]  ;;  %v210_v9 = vld [vmem:[%s2083_s1 + $0x598] sm:$0xff] }
  0x41   :  { %1040 = vmatpush3.msra.mxu1 %v129_v2  ;;  %1006 = vmatprep.subr.mxu0 %v112_v3  ;;  %v195_v2 = vld [vmem:[%s2083_s1 + $0x520] sm:$0xff]  ;;  %v178_v3 = vld [vmem:[%s2083_s1 + $0x498] sm:$0xff] }
  0x42   :  { %1041 = vmatprep.subr.mxu1 %v144_v4  ;;  %1007 = vmatpush3.msra.mxu0 %v96_v5 }
  0x43   :  { %1042 = vmatpush3.msra.mxu1 %v128_v6  ;;  %1008 = vmatprep.subr.mxu0 %v111_v7 }
  0x44   :  { %1043 = vmatprep.subr.mxu1 %v143_v8  ;;  %1009 = vmatpush3.msra.mxu0 %v95_v10 }
  0x45   :  { %491 = vmatprep.mubr.f32.mxu0 %v1630_v11  ;;  %1044 = vmatpush3.msra.mxu1 %v127_v12 }
  0x46   :  { %492 = vmatmul.mubr.f32.vlgmr.msra.gmra.mxu0 %v1638_v13  ;;  %561 = vmatprep.mubr.f32.mxu1 %v1643_v14 }
  0x47   :  { %1048 = vmatprep.subr.mxu0 %v190_v15  ;;  %1083 = vmatprep.subr.mxu1 %v222_v16 }
  0x48   :  { %562 = vmatmul.mubr.f32.vlgmr.msra.gmra.mxu1 %v1655_v17  ;;  %1049 = vmatpush3.msra.mxu0 %v174_v18 }
  0x49   :  { %1084 = vmatpush3.msra.mxu1 %v206_v19  ;;  %1050 = vmatprep.subr.mxu0 %v189_v20 }
  0x4a   :  { %1085 = vmatprep.subr.mxu1 %v221_v21  ;;  %1051 = vmatpush3.msra.mxu0 %v173_v22 }
  0x4b   :  { %1086 = vmatpush3.msra.mxu1 %v205_v23  ;;  %1052 = vmatprep.subr.mxu0 %v188_v24 }
  0x4c   :  { %1087 = vmatprep.subr.mxu1 %v220_v25  ;;  %1053 = vmatpush3.msra.mxu0 %v172_v26 }
  0x4d   :  { %1088 = vmatpush3.msra.mxu1 %v204_v27  ;;  %1054 = vmatprep.subr.mxu0 %v187_v28 }
  0x4e   :  { %1089 = vmatprep.subr.mxu1 %v219_v29  ;;  %1055 = vmatpush3.msra.mxu0 %v171_v30 }
  0x4f   :  { %1090 = vmatpush3.msra.mxu1 %v203_v31  ;;  %1056 = vmatprep.subr.mxu0 %v186_v32 }
  0x50   :  { %1091 = vmatprep.subr.mxu1 %v218_v33  ;;  %1057 = vmatpush3.msra.mxu0 %v170_v34 }
  0x51   :  { %1092 = vmatpush3.msra.mxu1 %v202_v35  ;;  %1058 = vmatprep.subr.mxu0 %v185_v36 }
  0x52   :  { %1093 = vmatprep.subr.mxu1 %v217_v37  ;;  %1059 = vmatpush3.msra.mxu0 %v169_v38 }
  0x53   :  { %1094 = vmatpush3.msra.mxu1 %v201_v39  ;;  %1060 = vmatprep.subr.mxu0 %v184_v40 }
  0x54   :  { %1095 = vmatprep.subr.mxu1 %v216_v41  ;;  %1061 = vmatpush3.msra.mxu0 %v168_v42 }
  0x55   :  { %1096 = vmatpush3.msra.mxu1 %v200_v43  ;;  %1062 = vmatprep.subr.mxu0 %v183_v44 }
  0x56   :  { %1097 = vmatprep.subr.mxu1 %v215_v45  ;;  %1063 = vmatpush3.msra.mxu0 %v167_v46 }
  0x57   :  { %1098 = vmatpush3.msra.mxu1 %v199_v47  ;;  %1064 = vmatprep.subr.mxu0 %v182_v48 }
  0x58   :  { %1099 = vmatprep.subr.mxu1 %v214_v49  ;;  %1065 = vmatpush3.msra.mxu0 %v166_v50 }
  0x59   :  { %1100 = vmatpush3.msra.mxu1 %v198_v51  ;;  %1066 = vmatprep.subr.mxu0 %v181_v52 }
  0x5a   :  { %1101 = vmatprep.subr.mxu1 %v213_v53  ;;  %1067 = vmatpush3.msra.mxu0 %v165_v55 }
  0x5b   :  { %1102 = vmatpush3.msra.mxu1 %v197_v56  ;;  %1068 = vmatprep.subr.mxu0 %v180_v57 }
  0x5c   :  { %1103 = vmatprep.subr.mxu1 %v212_v58  ;;  %1069 = vmatpush3.msra.mxu0 %v164_v59 }
  0x5d   :  { %1104 = vmatpush3.msra.mxu1 %v196_v60 }
  0x5e   :  { %8 = vsyncpa [#allocation3], 0  ;;  %1070 = vmatprep.subr.mxu0 %v179_v61  ;;  %1105 = vmatprep.subr.mxu1 %v211_v62  ;;  %v162_v4 = vld [vmem:[%s2083_s1 + $0x418] sm:$0xff]  ;;  %v177_v6 = vld [vmem:[%s2083_s1 + $0x490] sm:$0xff]  ;;  %v867_v8 = vadd.f32 %v866_v0, %v852_v63  ;;  %v853_v10 = vmul.f32 %v1655_v17, %v1655_v17  ;;  %v854_v20 = vmul.f32 %v1643_v14, %v1643_v14  ;;  %s1211_s16 = smov [#allocation2]   ;;  %vm891_vm0 = vcmask 48128  }
  0x5f   :  { %v194_v5 = vld [vmem:[%s2083_s1 + $0x518] sm:$0xff]  ;;  %1071 = vmatpush3.msra.mxu0 %v163_v1  ;;  %1106 = vmatpush3.msra.mxu1 %v195_v2  ;;  %v209_v7 = vld [vmem:[%s2083_s1 + $0x590] sm:$0xff]  ;;  %v176_v13 = vld [vmem:[%s2083_s1 + $0x488] sm:$0xff]  ;;  %s899_s17 = sshll.u32 %s1211_s16, 4  ;;  %s900_s17 = int_to_ptr.vmem [resolvable:$true] %s899_s17 }
  0x60   :  { %1072 = vmatprep.subr.mxu0 %v178_v3  ;;  %1107 = vmatprep.subr.mxu1 %v210_v9  ;;  %v161_v11 = vld [vmem:[%s2083_s1 + $0x410] sm:$0xff]  ;;  %v208_v15 = vld [vmem:[%s2083_s1 + $0x588] sm:$0xff]  ;;  %v175_v18 = vld [vmem:[%s2083_s1 + $0x480] sm:$0xff]  ;;  %v868_v21 = vadd.f32 %v867_v8, %v853_v10  ;;  %s1189_s18 = scalar_lea.vmem %s900_s17, 128  ;;  %p1194_p1 = scmp.lt.s32.totalorder %s900_s17, %s900_s17 }
  0x61   :  { %v193_v12 = vld [vmem:[%s2083_s1 + $0x510] sm:$0xff]  ;;  %1073 = vmatpush3.msra.mxu0 %v162_v4  ;;  %1108 = vmatpush3.msra.mxu1 %v194_v5  ;;  %v160_v16 = vld [vmem:[%s2083_s1 + $0x408] sm:$0xff]  ;;  %v207_v19 = vld [vmem:[%s2083_s1 + $0x580] sm:$0xff]  ;;  %p1190_p0 = scmp.ne.s32.totalorder %s900_s17, %s1189_s18  ;;  %p1195_p2 = scmp.lt.s32.totalorder %s1189_s18, %s1189_s18 }
  0x62   :  { %1074 = vmatprep.subr.mxu0 %v177_v6  ;;  %1109 = vmatprep.subr.mxu1 %v209_v7  ;;  %v192_v17 = vld [vmem:[%s2083_s1 + $0x508] sm:$0xff]  ;;  %v159_v22 = vld [vmem:[%s2083_s1 + $0x400] sm:$0xff]  ;;  %v26_v25 = vld [vmem:[%s2082_s0 + $0x58] sm:$0xff]  ;;  %v869_v29 = vadd.f32 %v868_v21, %v854_v20 }
  0x63   :  { %1075 = vmatpush3.msra.mxu0 %v161_v11  ;;  %1110 = vmatpush3.msra.mxu1 %v193_v12  ;;  %v24_v23 = vld [vmem:[%s2082_s0 + $0x48] sm:$0xff]  ;;  %v191_v24 = vld [vmem:[%s2083_s1 + $0x500] sm:$0xff]  ;;  %v254_v26 = vld [vmem:[%s2083_s1 + $0x6f8] sm:$0xff]  ;;  %v858_v59 = vmul.f32 %v26_v25, %v26_v25  ;;  %p1196_p3 = por %p1195_p2, %p1194_p1 }
  0x64   :  { %1076 = vmatprep.subr.mxu0 %v176_v13  ;;  %1111 = vmatprep.subr.mxu1 %v208_v15  ;;  %v23_v14 = vld [vmem:[%s2082_s0 + $0x40] sm:$0xff]  ;;  %v286_v27 = vld [vmem:[%s2083_s1 + $0x7f8] sm:$0xff]  ;;  %v25_v28 = vld [vmem:[%s2082_s0 + $0x50] sm:$0xff]  ;;  %v856_v39 = vmul.f32 %v24_v23, %v24_v23 }
  0x65   :  { %1077 = vmatpush3.msra.mxu0 %v160_v16  ;;  %1112 = vmatpush3.msra.mxu1 %v192_v17  ;;  %v855_v30 = vmul.f32 %v23_v14, %v23_v14  ;;  %v238_v31 = vld [vmem:[%s2083_s1 + $0x678] sm:$0xff]  ;;  %v253_v33 = vld [vmem:[%s2083_s1 + $0x6f0] sm:$0xff]  ;;  %v252_v37 = vld [vmem:[%s2083_s1 + $0x6e8] sm:$0xff]  ;;  %v857_v50 = vmul.f32 %v25_v28, %v25_v28  ;;  %p1197_p4 = pnand %p1196_p3, %p1190_p0 }
  0x66   :  { %1078 = vmatprep.subr.mxu0 %v175_v18  ;;  %1113 = vmatprep.subr.mxu1 %v207_v19  ;;  %v270_v32 = vld [vmem:[%s2083_s1 + $0x778] sm:$0xff]  ;;  %v285_v34 = vld [vmem:[%s2083_s1 + $0x7f0] sm:$0xff]  ;;  %v284_v38 = vld [vmem:[%s2083_s1 + $0x7e8] sm:$0xff] }
  0x67   :  { %1079 = vmatpush3.msra.mxu0 %v159_v22  ;;  %631 = vmatprep.mubr.f32.mxu0 %v24_v23  ;;  %v237_v35 = vld [vmem:[%s2083_s1 + $0x670] sm:$0xff]  ;;  %v870_v40 = vadd.f32 %v869_v29, %v855_v30  ;;  %v236_v41 = vld [vmem:[%s2083_s1 + $0x668] sm:$0xff]  ;;  %v251_v43 = vld [vmem:[%s2083_s1 + $0x6e0] sm:$0xff] }
  0x68   :  { %1114 = vmatpush3.msra.mxu1 %v191_v24  ;;  %632 = vmatmul.mubr.f32.vlgmr.msra.gmra.mxu0 %v23_v14  ;;  %v269_v36 = vld [vmem:[%s2083_s1 + $0x770] sm:$0xff]  ;;  %v268_v42 = vld [vmem:[%s2083_s1 + $0x768] sm:$0xff]  ;;  %v283_v44 = vld [vmem:[%s2083_s1 + $0x7e0] sm:$0xff] }
  0x69   :  { %701 = vmatprep.mubr.f32.mxu1 %v26_v25  ;;  %1118 = vmatprep.subr.mxu0 %v254_v26  ;;  %v235_v45 = vld [vmem:[%s2083_s1 + $0x660] sm:$0xff]  ;;  %v250_v47 = vld [vmem:[%s2083_s1 + $0x6d8] sm:$0xff]  ;;  %v871_v49 = vadd.f32 %v870_v40, %v856_v39  ;;  %v249_v53 = vld [vmem:[%s2083_s1 + $0x6d0] sm:$0xff] }
  0x6a   :  { %1153 = vmatprep.subr.mxu1 %v286_v27  ;;  %702 = vmatmul.mubr.f32.vlgmr.msra.gmra.mxu1 %v25_v28  ;;  %v267_v46 = vld [vmem:[%s2083_s1 + $0x760] sm:$0xff]  ;;  %v282_v48 = vld [vmem:[%s2083_s1 + $0x7d8] sm:$0xff]  ;;  %v281_v54 = vld [vmem:[%s2083_s1 + $0x7d0] sm:$0xff] }
  0x6b   :  { %1119 = vmatpush3.msra.mxu0 %v238_v31  ;;  %1154 = vmatpush3.msra.mxu1 %v270_v32  ;;  %v234_v51 = vld [vmem:[%s2083_s1 + $0x658] sm:$0xff]  ;;  %v233_v55 = vld [vmem:[%s2083_s1 + $0x650] sm:$0xff]  ;;  %v248_v57 = vld [vmem:[%s2083_s1 + $0x6c8] sm:$0xff]  ;;  %v872_v60 = vadd.f32 %v871_v49, %v857_v50 }
  0x6c   :  { %1120 = vmatprep.subr.mxu0 %v253_v33  ;;  %1155 = vmatprep.subr.mxu1 %v285_v34  ;;  %v266_v52 = vld [vmem:[%s2083_s1 + $0x758] sm:$0xff]  ;;  %v265_v56 = vld [vmem:[%s2083_s1 + $0x750] sm:$0xff]  ;;  %v280_v58 = vld [vmem:[%s2083_s1 + $0x7c8] sm:$0xff] }
  0x6d   :  { %1121 = vmatpush3.msra.mxu0 %v237_v35  ;;  %1156 = vmatpush3.msra.mxu1 %v269_v36  ;;  %v232_v61 = vld [vmem:[%s2083_s1 + $0x648] sm:$0xff]  ;;  %v247_v63 = vld [vmem:[%s2083_s1 + $0x6c0] sm:$0xff]  ;;  %v246_v3 = vld [vmem:[%s2083_s1 + $0x6b8] sm:$0xff]  ;;  %v873_v8 = vadd.f32 %v872_v60, %v858_v59 }
  0x6e   :  { %1122 = vmatprep.subr.mxu0 %v252_v37  ;;  %1157 = vmatprep.subr.mxu1 %v284_v38  ;;  %v264_v62 = vld [vmem:[%s2083_s1 + $0x748] sm:$0xff]  ;;  %v279_v0 = vld [vmem:[%s2083_s1 + $0x7c0] sm:$0xff]  ;;  %v278_v9 = vld [vmem:[%s2083_s1 + $0x7b8] sm:$0xff] }
  0x6f   :  { %1123 = vmatpush3.msra.mxu0 %v236_v41  ;;  %1158 = vmatpush3.msra.mxu1 %v268_v42  ;;  %v231_v1 = vld [vmem:[%s2083_s1 + $0x640] sm:$0xff]  ;;  %v230_v5 = vld [vmem:[%s2083_s1 + $0x638] sm:$0xff]  ;;  %v245_v10 = vld [vmem:[%s2083_s1 + $0x6b0] sm:$0xff] }
  0x70   :  { %1124 = vmatprep.subr.mxu0 %v251_v43  ;;  %1159 = vmatprep.subr.mxu1 %v283_v44  ;;  %v263_v2 = vld [vmem:[%s2083_s1 + $0x740] sm:$0xff]  ;;  %v262_v6 = vld [vmem:[%s2083_s1 + $0x738] sm:$0xff]  ;;  %v277_v11 = vld [vmem:[%s2083_s1 + $0x7b0] sm:$0xff] }
  0x71   :  { %1125 = vmatpush3.msra.mxu0 %v235_v45  ;;  %1160 = vmatpush3.msra.mxu1 %v267_v46  ;;  %v1972_v4 = vld [vmem:[%s2082_s0 + $0x60] sm:$0xff]  ;;  %v229_v12 = vld [vmem:[%s2083_s1 + $0x630] sm:$0xff]  ;;  %v244_v15 = vld [vmem:[%s2083_s1 + $0x6a8] sm:$0xff] }
  0x72   :  { %1126 = vmatprep.subr.mxu0 %v250_v47  ;;  %1161 = vmatprep.subr.mxu1 %v282_v48  ;;  %v859_v7 = vmul.f32 %v1972_v4, %v1972_v4  ;;  %v261_v13 = vld [vmem:[%s2083_s1 + $0x730] sm:$0xff]  ;;  %v276_v16 = vld [vmem:[%s2083_s1 + $0x7a8] sm:$0xff]  ;;  %v243_v22 = vld [vmem:[%s2083_s1 + $0x6a0] sm:$0xff] }
  0x73   :  { %1127 = vmatpush3.msra.mxu0 %v234_v51  ;;  %1162 = vmatpush3.msra.mxu1 %v266_v52  ;;  %v28_v17 = vld [vmem:[%s2082_s0 + $0x68] sm:$0xff]  ;;  %v275_v23 = vld [vmem:[%s2083_s1 + $0x7a0] sm:$0xff]  ;;  %v242_v25 = vld [vmem:[%s2083_s1 + $0x698] sm:$0xff] }
  0x74   :  { %1128 = vmatprep.subr.mxu0 %v249_v53  ;;  %1163 = vmatprep.subr.mxu1 %v281_v54  ;;  %v228_v18 = vld [vmem:[%s2083_s1 + $0x628] sm:$0xff]  ;;  %v860_v20 = vmul.f32 %v28_v17, %v28_v17  ;;  %v874_v21 = vadd.f32 %v873_v8, %v859_v7  ;;  %v227_v24 = vld [vmem:[%s2083_s1 + $0x620] sm:$0xff]  ;;  %v274_v26 = vld [vmem:[%s2083_s1 + $0x798] sm:$0xff] }
  0x75   :  { %1129 = vmatpush3.msra.mxu0 %v233_v55  ;;  %1164 = vmatpush3.msra.mxu1 %v265_v56  ;;  %v260_v19 = vld [vmem:[%s2083_s1 + $0x728] sm:$0xff]  ;;  %v259_v14 = vld [vmem:[%s2083_s1 + $0x720] sm:$0xff]  ;;  %v29_v27 = vld [vmem:[%s2082_s0 + $0x70] sm:$0xff] }
  0x76   :  { %1130 = vmatprep.subr.mxu0 %v248_v57  ;;  %1165 = vmatprep.subr.mxu1 %v280_v58  ;;  %v226_v28 = vld [vmem:[%s2083_s1 + $0x618] sm:$0xff]  ;;  %v861_v30 = vmul.f32 %v29_v27, %v29_v27  ;;  %v875_v31 = vadd.f32 %v874_v21, %v860_v20  ;;  %v241_v32 = vld [vmem:[%s2083_s1 + $0x690] sm:$0xff]  ;;  %v240_v36 = vld [vmem:[%s2083_s1 + $0x688] sm:$0xff] }
  0x77   :  { %1131 = vmatpush3.msra.mxu0 %v232_v61  ;;  %1166 = vmatpush3.msra.mxu1 %v264_v62  ;;  %v258_v29 = vld [vmem:[%s2083_s1 + $0x718] sm:$0xff]  ;;  %v273_v33 = vld [vmem:[%s2083_s1 + $0x790] sm:$0xff]  ;;  %v272_v37 = vld [vmem:[%s2083_s1 + $0x788] sm:$0xff] }
  0x78   :  { %1132 = vmatprep.subr.mxu0 %v247_v63  ;;  %1167 = vmatprep.subr.mxu1 %v279_v0  ;;  %v225_v34 = vld [vmem:[%s2083_s1 + $0x610] sm:$0xff]  ;;  %v30_v38 = vld [vmem:[%s2082_s0 + $0x78] sm:$0xff]  ;;  %v224_v39 = vld [vmem:[%s2083_s1 + $0x608] sm:$0xff]  ;;  %v876_v42 = vadd.f32 %v875_v31, %v861_v30 }
  0x79   :  { %1133 = vmatpush3.msra.mxu0 %v231_v1  ;;  %1168 = vmatpush3.msra.mxu1 %v263_v2  ;;  %v257_v35 = vld [vmem:[%s2083_s1 + $0x710] sm:$0xff]  ;;  %v256_v40 = vld [vmem:[%s2083_s1 + $0x708] sm:$0xff]  ;;  %v862_v41 = vmul.f32 %v30_v38, %v30_v38  ;;  %v239_v43 = vld [vmem:[%s2083_s1 + $0x680] sm:$0xff] }
  0x7a   :  { %1134 = vmatprep.subr.mxu0 %v246_v3  ;;  %1169 = vmatprep.subr.mxu1 %v278_v9  ;;  %v271_v44 = vld [vmem:[%s2083_s1 + $0x780] sm:$0xff] }
  0x7b   :  { %1135 = vmatpush3.msra.mxu0 %v230_v5  ;;  %1170 = vmatpush3.msra.mxu1 %v262_v6  ;;  %v223_v45 = vld [vmem:[%s2083_s1 + $0x600] sm:$0xff]  ;;  %v877_v47 = vadd.f32 %v876_v42, %v862_v41 }
  0x7c   :  { %1136 = vmatprep.subr.mxu0 %v245_v10  ;;  %1171 = vmatprep.subr.mxu1 %v277_v11  ;;  %v255_v46 = vld [vmem:[%s2083_s1 + $0x700] sm:$0xff] }
  0x7d   :  { %1137 = vmatpush3.msra.mxu0 %v229_v12  ;;  %1172 = vmatpush3.msra.mxu1 %v261_v13 }
  0x7e   :  { %1138 = vmatprep.subr.mxu0 %v244_v15  ;;  %1173 = vmatprep.subr.mxu1 %v276_v16 }
  0x7f   :  { %1139 = vmatpush3.msra.mxu0 %v228_v18  ;;  %1174 = vmatpush3.msra.mxu1 %v260_v19  ;;  %v907_v18 = vld [vmem:[%s2084_s2] ss:$0 sm:$0xff] }
  0x80   :  { %1140 = vmatprep.subr.mxu0 %v243_v22  ;;  %1175 = vmatprep.subr.mxu1 %v275_v23 }
  0x81   :  { %1141 = vmatpush3.msra.mxu0 %v227_v24  ;;  %1176 = vmatpush3.msra.mxu1 %v259_v14 }
  0x82   :  { %1142 = vmatprep.subr.mxu0 %v242_v25  ;;  %1177 = vmatprep.subr.mxu1 %v274_v26 }
  0x83   :  { %1143 = vmatpush3.msra.mxu0 %v226_v28  ;;  %1178 = vmatpush3.msra.mxu1 %v258_v29 }
  0x84   :  { %1144 = vmatprep.subr.mxu0 %v241_v32  ;;  %1179 = vmatprep.subr.mxu1 %v273_v33 }
  0x85   :  { %1145 = vmatpush3.msra.mxu0 %v225_v34  ;;  %1180 = vmatpush3.msra.mxu1 %v257_v35 }
  0x86   :  { %1146 = vmatprep.subr.mxu0 %v240_v36  ;;  %1181 = vmatprep.subr.mxu1 %v272_v37 }
  0x87   :  { %1147 = vmatpush3.msra.mxu0 %v224_v39  ;;  %1182 = vmatpush3.msra.mxu1 %v256_v40 }
  0x88   :  { %1148 = vmatprep.subr.mxu0 %v239_v43  ;;  %1183 = vmatprep.subr.mxu1 %v271_v44 }
  0x89   :  { %1149 = vmatpush3.msra.mxu0 %v223_v45  ;;  %771 = vmatprep.mubr.f32.mxu0 %v28_v17 }
  0x8a   :  { %1184 = vmatpush3.msra.mxu1 %v255_v46  ;;  %841 = vmatprep.mubr.f32.mxu1 %v30_v38 }
  0x8b   :  { %772 = vmatmul.mubr.f32.vlgmr.msra.gmra.mxu0 %v1972_v4  ;;  %842 = vmatmul.mubr.f32.vlgmr.msra.gmra.mxu1 %v29_v27 }
  0x8c   :  { %878 = vadd.xlane.f32.xlu0 %v877_v47 }
  0xe4   :  { %v940_v48 = vpop.f32.mrf.mxu0 }
  0xe5   :  { %v975_v49 = vpop.f32.mrf.mxu1 }
  0xe6   :  { %v941_v50 = vpop.f32.mrf.mxu0 }
  0xe7   :  { %v976_v52 = vpop.f32.mrf.mxu1  ;;  %v942_v55 = vadd.f32 %v941_v50, %v940_v48 }
  0xe8   :  { %v977_v56 = vadd.f32 %v976_v52, %v975_v49 }
  0xea   :  { %v424_v60 = vadd.f32 %v977_v56, %v942_v55 }
 0x106   :  { %v1010_v51 = vpop.f32.mrf.mxu0 }
 0x108   :  { %v1045_v53 = vpop.f32.mrf.mxu1  ;;  %v1011_v54 = vpop.f32.mrf.mxu0 }
 0x109   :  { %v1012_v58 = vadd.f32 %v1011_v54, %v1010_v51 }
 0x10a   :  { %v1046_v59 = vpop.f32.mrf.mxu1 }
 0x10b   :  { %v494_v63 = vadd.f32 %v1012_v58, %v424_v60  ;;  %v1047_v0 = vadd.f32 %v1046_v59, %v1045_v53 }
 0x10d   :  { %v564_v3 = vadd.f32 %v1047_v0, %v494_v63 }
 0x115   :  { %v879_v16 = vpop.xlane.xlu0 %878 }
 0x128   :  { %v1080_v57 = vpop.f32.mrf.mxu0 }
 0x12a   :  { %v1115_v61 = vpop.f32.mrf.mxu1  ;;  %v1081_v62 = vpop.f32.mrf.mxu0 }
 0x12b   :  { %v1082_v1 = vadd.f32 %v1081_v62, %v1080_v57 }
 0x12c   :  { %v1116_v2 = vpop.f32.mrf.mxu1 }
 0x12d   :  { %v634_v9 = vadd.f32 %v1082_v1, %v564_v3  ;;  %v1117_v4 = vadd.f32 %v1116_v2, %v1115_v61 }
 0x12f   :  { %v704_v10 = vadd.f32 %v1117_v4, %v634_v9 }
 0x14b   :  { %v1150_v5 = vpop.f32.mrf.mxu0  ;;  %v1185_v6 = vpop.f32.mrf.mxu1 }
 0x14d   :  { %v1151_v7 = vpop.f32.mrf.mxu0  ;;  %v1186_v8 = vpop.f32.mrf.mxu1 }
 0x14e   :  { %v1152_v11 = vadd.f32 %v1151_v7, %v1150_v5  ;;  %v1187_v13 = vadd.f32 %v1186_v8, %v1185_v6 }
 0x150   :  { %v774_v12 = vadd.f32 %v1152_v11, %v704_v10 }
 0x152   :  { %v844_v15 = vadd.f32 %v1187_v13, %v774_v12 }
 0x154   :  { %v880_v17 = vmul.f32 2.0, %v844_v15 }
 0x156   :  { %v881_v19 = vsub.f32 %v879_v16, %v880_v17 }
 0x158   :  { %v889_v20 = vadd.f32 %v907_v18, %v881_v19 }
 0x15a   :  { %v890_v21 = vmul.f32 -0.1, %v889_v20 }
 0x15c   :  { %892 = vst.msk [vmem:[#allocation2] sm:$0xff] %vm891_vm0, %v890_v21 }
 0x15d   :  { %1200 = shalt.err (!%p1197_p4)
}
 0x15e   :  { %902 = dma.vmem_to_hbm [thread:$0]  %s900_s17, 128, %s2085_s3, [#allocation3]  }
 0x15f   :  { %1209 = dma.done.wait [#allocation3], 128  }
 0x160   :  { %1210 = vsyncadd [#allocation3], 4294967168 }
 0x161   :  { %906 = vsyncpa [#allocation3], 1 }

</bundles_post_ra>
